<compile_context>
chip_gen: v6e
topology: v6e:2x2x1
jax: 0.10.0
libtpu: 0.0.40
codegen_flags: <defaults>
</compile_context>

<pallas_src>
import jax
import jax.numpy as jnp
from jax import lax
from jax.experimental import pallas as pl
from jax.experimental.pallas import tpu as pltpu


def _round_up(x, m):
    return ((x + m - 1) // m) * m


def _encoder_image_full_kernel(x_ref, w_ref, b_ref, o_ref, acc_ref, ss_ref):
    # x_ref: (tb, tk)   w_ref: (tk, E)   b_ref: (1, E)   o_ref: (tb, E)
    # acc_ref: (tb, E) f32 accumulator   ss_ref: (tb, 1) f32 row sq-norm accum
    k = pl.program_id(1)

    @pl.when(k == 0)
    def _():
        acc_ref[...] = jnp.zeros_like(acc_ref)
        ss_ref[...] = jnp.zeros_like(ss_ref)

    x = x_ref[...]
    xf = x.astype(jnp.float32)

    # Accumulate row squared-norm of the UN-normalized input (hoisted l2norm).
    ss_ref[...] += jnp.sum(xf * xf, axis=1, keepdims=True)

    # MXU matmul on native-dtype operands with f32 accumulation.
    acc_ref[...] += jnp.dot(x, w_ref[...], preferred_element_type=jnp.float32)

    @pl.when(k == pl.num_programs(1) - 1)
    def _():
        # (x / ||x||) @ W  ==  (x @ W) * rsqrt(sum(x^2)); bias added AFTER scale.
        inv_n = lax.rsqrt(ss_ref[...])
        y = acc_ref[...] * inv_n + b_ref[...].astype(jnp.float32)

        # Second l2norm (no_imgnorm=False).  Matches PyTorch (no eps).
        inv_n2 = lax.rsqrt(jnp.sum(y * y, axis=1, keepdims=True))
        out = y * inv_n2

        # use_abs=False by default; would be jnp.abs(out) otherwise.
        o_ref[...] = out.astype(o_ref.dtype)


def encoder_image_full(images, w_t, bias, *, tb=256, tk=512):
    """images: [B, D_in], w_t: [D_in, E] (fc.weight.T), bias: [E] -> [B, E]."""
    B, D_in = images.shape
    D_in_w, E = w_t.shape
    assert D_in == D_in_w
    assert bias.shape == (E,)

    out_dtype = images.dtype

    # MXU/lane-aligned tile sizes, clipped to the (padded) problem size.
    tb_eff = min(tb, _round_up(B, 8))
    tk_eff = min(tk, _round_up(D_in, 128))

    B_pad = _round_up(B, tb_eff)
    D_pad = _round_up(D_in, tk_eff)

    # Zero padding: padded K columns/rows contribute 0 to both the matmul and
    # the squared-norm accumulator; padded batch rows are sliced off below.
    if B_pad != B or D_pad != D_in:
        images = jnp.pad(images, ((0, B_pad - B), (0, D_pad - D_in)))
    if D_pad != D_in:
        w_t = jnp.pad(w_t, ((0, D_pad - D_in), (0, 0)))

    bias2d = bias.reshape(1, E)

    out = pl.pallas_call(
        _encoder_image_full_kernel,
        out_shape=jax.ShapeDtypeStruct((B_pad, E), out_dtype),
        grid_spec=pltpu.PrefetchScalarGridSpec(
            num_scalar_prefetch=0,
            grid=(B_pad // tb_eff, D_pad // tk_eff),
            in_specs=[
                pl.BlockSpec((tb_eff, tk_eff), lambda i, k: (i, k)),  # x tile
                pl.BlockSpec((tk_eff, E), lambda i, k: (k, 0)),       # W slab
                pl.BlockSpec((1, E), lambda i, k: (0, 0)),            # bias
            ],
            out_specs=pl.BlockSpec((tb_eff, E), lambda i, k: (i, 0)),
            scratch_shapes=[
                pltpu.VMEM((tb_eff, E), jnp.float32),   # matmul accumulator
                pltpu.VMEM((tb_eff, 1), jnp.float32),   # row squared-norm
            ],
        ),
        compiler_params=pltpu.CompilerParams(
            dimension_semantics=("parallel", "arbitrary")),
    )(images, w_t, bias2d)

    return out[:B] if B_pad != B else out


def reference(images, w_t, bias):
    x = images.astype(jnp.float32)
    x = x / jnp.sqrt(jnp.sum(x * x, axis=1, keepdims=True))
    y = x @ w_t.astype(jnp.float32) + bias.astype(jnp.float32)
    y = y / jnp.sqrt(jnp.sum(y * y, axis=1, keepdims=True))
    return y


if __name__ == "__main__":
    # Small synthetic shapes consistent with the module:
    #   images (precomputed CNN features): [B, D_in]; fc: D_in -> embed_size.
    B, D_in, E = 8, 256, 128

    key = jax.random.PRNGKey(0)
    k_img, k_w = jax.random.split(key)

    images = jax.random.normal(k_img, (B, D_in), dtype=jnp.float32)

    # Xavier-uniform init for fc, matching init_weights(): r = sqrt(6)/sqrt(in+out)
    r = jnp.sqrt(6.0) / jnp.sqrt(float(D_in + E))
    fc_weight = jax.random.uniform(k_w, (E, D_in), minval=-r, maxval=r,
                                   dtype=jnp.float32)  # torch layout [out, in]
    fc_bias = jnp.zeros((E,), dtype=jnp.float32)        # bias filled with 0

    w_t = fc_weight.T  # [D_in, E] for the kernel matmul

    # tk=128 so the small demo exercises the K-tiled accumulator path (2 K steps).
    out = encoder_image_full(images, w_t, fc_bias, tk=128)
    out = jax.block_until_ready(out)

    ref = reference(images, w_t, fc_bias)
    assert out.shape == (B, E)
    assert jnp.allclose(out, ref, atol=1e-5, rtol=1e-5)

    print("KERNEL_OK")
</pallas_src>

<mosaic_0001>
module attributes {stable_mosaic.version = 11 : i64} {
  func.func @_encoder_image_full_kernel(%arg0: i32, %arg1: i32, %arg2: memref<8x128xf32, #tpu.memory_space<vmem>>, %arg3: memref<128x128xf32, #tpu.memory_space<vmem>>, %arg4: memref<1x128xf32, #tpu.memory_space<vmem>>, %arg5: memref<8x128xf32, #tpu.memory_space<vmem>>, %arg6: memref<8x128xf32, #tpu.memory_space<vmem>>, %arg7: memref<8x1xf32, #tpu.memory_space<vmem>>) attributes {dimension_semantics = [#tpu.dimension_semantics<parallel>, #tpu.dimension_semantics<arbitrary>], iteration_bounds = array<i64: 1, 2>, scalar_prefetch = 0 : i64, scratch_operands = 2 : i64, tpu.core_type = #tpu.core_type<tc>, window_params = [{transform_indices = @transform_0, window_bounds = array<i64: 8, 128>}, {transform_indices = @transform_1, window_bounds = array<i64: 128, 128>}, {pipeline_mode = #tpu.pipeline_mode<synchronous>, transform_indices = @transform_2, window_bounds = array<i64: 1, 128>}, {transform_indices = @transform_3, window_bounds = array<i64: 8, 128>}]} {
    %c0_i32 = arith.constant 0 : i32
    %0 = arith.cmpi eq, %arg1, %c0_i32 : i32
    %1 = arith.extui %0 : i1 to i32
    %c0_i32_0 = arith.constant 0 : i32
    %2 = arith.cmpi ne, %1, %c0_i32_0 : i32
    scf.if %2 {
      %cst_14 = arith.constant 0.000000e+00 : f32
      %18 = vector.broadcast %cst_14 : f32 to vector<8x128xf32>
      %c0_15 = arith.constant 0 : index
      %c0_16 = arith.constant 0 : index
      %19 = vector.load %arg6[%c0_15, %c0_16] : memref<8x128xf32, #tpu.memory_space<vmem>>, vector<8x128xf32>
      tpu.vector_store %arg6[%c0_15, %c0_16], %18 {strides = array<i32>} : memref<8x128xf32, #tpu.memory_space<vmem>>, vector<8x128xf32>,
      %cst_17 = arith.constant 0.000000e+00 : f32
      %20 = vector.broadcast %cst_17 : f32 to vector<8x1xf32>
      %c0_18 = arith.constant 0 : index
      %c0_19 = arith.constant 0 : index
      %21 = vector.load %arg7[%c0_18, %c0_19] : memref<8x1xf32, #tpu.memory_space<vmem>>, vector<8x1xf32>
      tpu.vector_store %arg7[%c0_18, %c0_19], %20 {strides = array<i32>} : memref<8x1xf32, #tpu.memory_space<vmem>>, vector<8x1xf32>,
    } else {
    }
    %c0 = arith.constant 0 : index
    %c0_1 = arith.constant 0 : index
    %3 = vector.load %arg2[%c0, %c0_1] : memref<8x128xf32, #tpu.memory_space<vmem>>, vector<8x128xf32>
    %c0_2 = arith.constant 0 : index
    %c0_3 = arith.constant 0 : index
    %4 = vector.load %arg7[%c0_2, %c0_3] : memref<8x1xf32, #tpu.memory_space<vmem>>, vector<8x1xf32>
    %5 = arith.mulf %3, %3 : vector<8x128xf32>
    %cst = arith.constant dense<0.000000e+00> : vector<8xf32>
    %6 = vector.multi_reduction <add>, %5, %cst [1] : vector<8x128xf32> to vector<8xf32>
    %7 = vector.shape_cast %6 : vector<8xf32> to vector<8x1xf32>
    %8 = arith.addf %4, %7 : vector<8x1xf32>
    %c0_4 = arith.constant 0 : index
    %c0_5 = arith.constant 0 : index
    %9 = vector.load %arg7[%c0_4, %c0_5] : memref<8x1xf32, #tpu.memory_space<vmem>>, vector<8x1xf32>
    tpu.vector_store %arg7[%c0_4, %c0_5], %8 {strides = array<i32>} : memref<8x1xf32, #tpu.memory_space<vmem>>, vector<8x1xf32>,
    %c0_6 = arith.constant 0 : index
    %c0_7 = arith.constant 0 : index
    %10 = vector.load %arg6[%c0_6, %c0_7] : memref<8x128xf32, #tpu.memory_space<vmem>>, vector<8x128xf32>
    %c0_8 = arith.constant 0 : index
    %c0_9 = arith.constant 0 : index
    %11 = vector.load %arg3[%c0_8, %c0_9] : memref<128x128xf32, #tpu.memory_space<vmem>>, vector<128x128xf32>
    %cst_10 = arith.constant dense<0.000000e+00> : vector<8x128xf32>
    %12 = tpu.matmul %3, %11, %cst_10 {dimension_numbers = #tpu.dot_dimension_numbers<[1], [0], [0], [1], [0, 0, 1, 1], [], []>} : vector<8x128xf32>, vector<128x128xf32>, vector<8x128xf32> -> vector<8x128xf32>
    %13 = arith.addf %10, %12 : vector<8x128xf32>
    %c0_11 = arith.constant 0 : index
    %c0_12 = arith.constant 0 : index
    %14 = vector.load %arg6[%c0_11, %c0_12] : memref<8x128xf32, #tpu.memory_space<vmem>>, vector<8x128xf32>
    tpu.vector_store %arg6[%c0_11, %c0_12], %13 {strides = array<i32>} : memref<8x128xf32, #tpu.memory_space<vmem>>, vector<8x128xf32>,
    %c1_i32 = arith.constant 1 : i32
    %15 = arith.cmpi eq, %arg1, %c1_i32 : i32
    %16 = arith.extui %15 : i1 to i32
    %c0_i32_13 = arith.constant 0 : i32
    %17 = arith.cmpi ne, %16, %c0_i32_13 : i32
    scf.if %17 {
      %c0_14 = arith.constant 0 : index
      %c0_15 = arith.constant 0 : index
      %18 = vector.load %arg7[%c0_14, %c0_15] : memref<8x1xf32, #tpu.memory_space<vmem>>, vector<8x1xf32>
      %19 = math.rsqrt %18 : vector<8x1xf32>
      %c0_16 = arith.constant 0 : index
      %c0_17 = arith.constant 0 : index
      %20 = vector.load %arg6[%c0_16, %c0_17] : memref<8x128xf32, #tpu.memory_space<vmem>>, vector<8x128xf32>
      %21 = vector.broadcast %19 : vector<8x1xf32> to vector<8x128xf32>
      %22 = arith.mulf %20, %21 : vector<8x128xf32>
      %c0_18 = arith.constant 0 : index
      %c0_19 = arith.constant 0 : index
      %23 = vector.load %arg4[%c0_18, %c0_19] : memref<1x128xf32, #tpu.memory_space<vmem>>, vector<1x128xf32>
      %24 = vector.broadcast %23 : vector<1x128xf32> to vector<8x128xf32>
      %25 = arith.addf %22, %24 : vector<8x128xf32>
      %26 = arith.mulf %25, %25 : vector<8x128xf32>
      %cst_20 = arith.constant dense<0.000000e+00> : vector<8xf32>
      %27 = vector.multi_reduction <add>, %26, %cst_20 [1] : vector<8x128xf32> to vector<8xf32>
      %28 = vector.shape_cast %27 : vector<8xf32> to vector<8x1xf32>
      %29 = math.rsqrt %28 : vector<8x1xf32>
      %30 = vector.broadcast %29 : vector<8x1xf32> to vector<8x128xf32>
      %31 = arith.mulf %25, %30 : vector<8x128xf32>
      %c0_21 = arith.constant 0 : index
      %c0_22 = arith.constant 0 : index
      %32 = vector.load %arg5[%c0_21, %c0_22] : memref<8x128xf32, #tpu.memory_space<vmem>>, vector<8x128xf32>
      tpu.vector_store %arg5[%c0_21, %c0_22], %31 {strides = array<i32>} : memref<8x128xf32, #tpu.memory_space<vmem>>, vector<8x128xf32>,
    } else {
    }
    return
  }
  func.func @transform_0(%arg0: i32, %arg1: i32) -> (i32, i32) {
    %c0_i32 = arith.constant 0 : i32
    return %arg0, %arg1 : i32, i32
  }
  func.func @transform_1(%arg0: i32, %arg1: i32) -> (i32, i32) {
    %c0_i32 = arith.constant 0 : i32
    %c0_i32_0 = arith.constant 0 : i32
    return %arg1, %c0_i32 : i32, i32
  }
  func.func @transform_2(%arg0: i32, %arg1: i32) -> (i32, i32) {
    %c0_i32 = arith.constant 0 : i32
    %c0_i32_0 = arith.constant 0 : i32
    %c0_i32_1 = arith.constant 0 : i32
    return %c0_i32, %c0_i32_0 : i32, i32
  }
  func.func @transform_3(%arg0: i32, %arg1: i32) -> (i32, i32) {
    %c0_i32 = arith.constant 0 : i32
    %c0_i32_0 = arith.constant 0 : i32
    return %arg0, %c0_i32 : i32, i32
  }
}

</mosaic_0001>

<bundles_post_ra>
// kernel: tpu_custom_call.1
= control target key start
LH: loop header
LB: loop body
LE: loop exit
PB: predicated region body
PF: predicated region fallthrough
CT: control target
= control target key end

     0   :  { %8 = vsyncpa [#allocation5], 0  ;;  %s945_s0 = inlined_call_operand.hbm [shape: f32[8,256], index: 0, kind: input, shape index: {}]   ;;  %s946_s1 = inlined_call_operand.hbm [shape: f32[256,128], index: 1, kind: input, shape index: {}]   ;;  %s947_s2 = inlined_call_operand.vmem [shape: f32[1,128], index: 2, kind: input, shape index: {}]   ;;  %s948_s3 = inlined_call_operand.hbm [shape: f32[8,128], index: 3, kind: output, shape index: {}]  }
   0x1   :  { %10 = vsyncpa [#allocation5 + $0x1], 0 }
   0x2   :  { %11 = vsyncpa [#allocation8], 0 }
   0x3   :  { %13 = vsyncpa [#allocation8 + $0x1], 0 }
   0x4   :  { %14 = vsyncpa [#allocation6], 0  ;;  %s780_s12 = smov 0   ;;  %s782_s13 = smov 0  }
   0x5   :  { %s784_s14 = smov 0   ;;  %s786_s15 = smov 0  }
   0x6   :  { %s788_s16 = smov 0   ;;  %s790_s17 = smov 0  }
   0x7 LB: > { %s462_s18 = sadd.s32 4294967295, %s749_s17   ;;  %s29_s19 = sadd.s32 1, %s745_s16  ;;  %s749_s17 = sphi %s790_s17, %s20_s17   ;;  %s745_s16 = sphi %s788_s16, %s958_s16   ;;  %s741_s15 = sphi %s786_s15, %s957_s15   ;;  %s737_s14 = sphi %s784_s14, %s956_s14   ;;  %s733_s13 = sphi %s782_s13, %s955_s13   ;;  %s729_s12 = sphi %s780_s12, %s954_s12  }
   0x8   : > { %p30_p0 = scmp.ge.s32.totalorder %s29_s19, 2  ;;  %s41_s20 = sadd.s32 1, %s737_s14 }
   0x9   : > { %p48_p1 = scmp.ne.s32.totalorder %s737_s14, %s733_s13  ;;  %p49_p2 = scmp.eq.s32.totalorder %s749_s17, 0 }
   0xa   : > { %s960_s19 = smov (%p30_p0, %s29_s19), 0  ;;  %p54_p4 = scmp.ne.s32.totalorder %s733_s13, %s729_s12 }
   0xb   : > { %p816_p3 = por %p49_p2, %p48_p1  ;;  %s37_s22 = ssub.s32 %s745_s16, %s960_s19 }
   0xc   : > { %p55_p5 = scmp.eq.s32.totalorder %s462_s18, 0  ;;  %p39_p6 = scmp.eq.s32.totalorder %s37_s22, 0 }
   0xd   : > { %p548_p8 = scmp.lt.s32.totalorder %s749_s17, 2  ;;  %s834_s25 = sand.u32 1, %s737_s14  }
   0xe   : > { %p825_p7 = por %p55_p5, %p54_p4  ;;  %s466_s26 = sshll.u32 %s745_s16, 7 }
   0xf   : > { %s831_s24 = scalar_select %p39_p6, %s737_s14, %s41_s20  }
  0x10   : > { %s465_s27 = sshll.u32 %s834_s25, 3  ;;  %s165_s30 = scalar_lea.hbm %s945_s0, %s466_s26 }
  0x11   : > { %s158_s4 = scalar_lea.vmem [#allocation4], %s465_s27  ;;  %p843_p9 = pnand %p548_p8, %p816_p3 }
  0x12   : > { %s167_s5 = sshll.u32 %s158_s4, 4  ;;  %p470_p10 = scmp.ge.s32.totalorder %s749_s17, 1  ;;  %s168_s5 = int_to_ptr.vmem [resolvable:$true] %s167_s5 }
  0x13   : > { %p193_p11 = scmp.lt.s32.totalorder %s749_s17, 3  ;;  %s155_s7 = scalar_lea.sflag [#allocation5], %s834_s25 }
  0x14   : > { %p613_p12 = pneg %p843_p9  ;;  %s624_s8 = scalar_lea.vmem %s168_s5, 128 }
  0x15   : > { %p625_p13 = scmp.ne.s32.totalorder %s168_s5, %s624_s8  ;;  %s751_s9 = smov [#allocation4]  }
  0x16   : > { %s629_s10 = sshll.u32 %s751_s9, 4  ;;  %s630_s10 = int_to_ptr.vmem [resolvable:$false] %s629_s10 }
  0x17   : > { %p627_p0 = pnand %p625_p13, %p613_p12  ;;  %s631_s11 = scalar_lea.vmem %s630_s10, 256 }
  0x18   : > { %p632_p2 = scmp.lt.s32.totalorder %s168_s5, %s630_s10  ;;  %p633_p3 = scmp.lt.s32.totalorder %s631_s11, %s624_s8 }
  0x19   : > { %p628_p1 = pneg %p627_p0 }
  0x1a   : > { %p634_p4 = por %p633_p3, %p632_p2 }
  0x1c   : > { %p635_p5 = pnand %p634_p4, %p628_p1 }
  0x1e   : > { %638 = shalt.err (!%p635_p5)
}
  0x1f   : > { %544 = dma.hbm_to_vmem [thread:$0]  (!%p843_p9), %s165_s30, 128, %s168_s5, %s155_s7  }
  0x20   : > { %p861_p6 = pnand %p470_p10, %p193_p11  ;;  %s467_s20 = sshll.u32 %s834_s25, 7 }
  0x21   : > { %s480_s21 = sshll.u32 %s745_s16, 11  ;;  %s178_s28 = scalar_lea.vmem [#allocation7], %s467_s20 }
  0x22   : > { %s184_s27 = scalar_lea.hbm %s946_s1, %s480_s21  ;;  %s185_s29 = sshll.u32 %s178_s28, 4  ;;  %s186_s29 = int_to_ptr.vmem [resolvable:$true] %s185_s29 }
  0x23   : > { %s175_s4 = scalar_lea.sflag [#allocation8], %s834_s25  ;;  %s652_s8 = scalar_lea.vmem %s186_s29, 2048 }
  0x24   : > { %p653_p8 = scmp.ne.s32.totalorder %s186_s29, %s652_s8  ;;  %s752_s30 = smov [#allocation7]  }
  0x25   : > { %s657_s5 = sshll.u32 %s752_s30, 4  ;;  %s658_s5 = int_to_ptr.vmem [resolvable:$false] %s657_s5 }
  0x26   : > { %p655_p13 = pnand %p653_p8, %p613_p12  ;;  %s659_s7 = scalar_lea.vmem %s658_s5, 4096 }
  0x27   : > { %p660_p10 = scmp.lt.s32.totalorder %s186_s29, %s658_s5  ;;  %p661_p11 = scmp.lt.s32.totalorder %s659_s7, %s652_s8 }
  0x28   : > { %p656_p0 = pneg %p655_p13 }
  0x29   : > { %p662_p1 = por %p661_p11, %p660_p10 }
  0x2b   : > { %p663_p2 = pnand %p662_p1, %p656_p0 }
  0x2d   : > { %666 = shalt.err (!%p663_p2)
}
  0x2e   : > { %s753_s9 = smov 128   ;;  %s754_s10 = smov 8  }
  0x2f   : > { %547 = dma.hbm_to_vmem [thread:$0]  (!%p843_p9), %s184_s27, 2048, %s186_s29, %s175_s4, %s753_s9, %s753_s9, %s754_s10  }
  0x30   : > { %197 = sbr.rel (%p861_p6) target bundleno = 610 (0x262), region = 32  ;;  %s199_s25 = sand.u32 (!%p861_p6), 1, %s733_s13  }
  0x31   : > { %s471_s11 = sshll.u32 (!%p861_p6), %s199_s25, 3  ;;  %s200_s20 = scalar_lea.sflag (!%p861_p6), [#allocation5], %s199_s25 }
  0x32   : > { %s203_s21 = scalar_lea.vmem (!%p861_p6), [#allocation4], %s471_s11 }
  0x35   : > { %716 = dma.done.wait (%p825_p7), %s200_s20, 128  }
  0x36   : > { %718 = vsyncadd (%p825_p7), %s200_s20, 4294967168  ;;  %s472_s22 = sshll.u32 %s199_s25, 7  ;;  %s209_s26 = scalar_lea.sflag [#allocation8], %s199_s25 }
  0x37   : > { %s883_s28 = scalar_lea.vmem [#allocation7], %s472_s22 }
  0x38   : > { %720 = dma.done.wait (%p825_p7), %s209_s26, 2048  }
  0x39   : > { %722 = vsyncadd (%p825_p7), %s209_s26, 4294965248  ;;  %p473_p9 = scmp.ne.s32.totalorder %s741_s15, 0 }
  0x3b   : > { %239 = sbr.rel (%p473_p9) target bundleno = 66 (0x42), region = 44 }
  0x40   : > { %vm241_vm0 = vcmask 7168   ;;  %v755_v0 = vmov 0.0  }
  0x41   : > { %240 = vst [vmem:[#allocation2] sm:$0xff] %v755_v0  ;;  %242 = vst.msk [vmem:[#allocation3] sm:$0xff] %vm241_vm0, %v755_v0 }
  0x42 PF: > { %v267_v1 = vld [vmem:[%s883_s28 + $0x78] sm:$0xff]  ;;  %v756_v2 = vmov 0.0   ;;  %v266_v3 = vld [vmem:[%s883_s28 + $0x70] sm:$0xff]  ;;  %vm757_vm1 = vmmov 0   ;;  %v265_v4 = vld [vmem:[%s883_s28 + $0x68] sm:$0xff]  ;;  %vm249_vm2 = vcmask 7168  }
  0x43   : > { %498 = vmatprep.subr.mxu0 %v756_v2  ;;  %530 = vmatprep.mubr.msk.f32.mxu0 %vm757_vm1, %v756_v2  ;;  %v264_v5 = vld [vmem:[%s883_s28 + $0x60] sm:$0xff]  ;;  %v243_v6 = vld [vmem:[%s203_s21] sm:$0xff]  ;;  %v261_v10 = vld [vmem:[%s883_s28 + $0x48] sm:$0xff]  ;;  %p474_p7 = scmp.ne.s32.totalorder %s741_s15, 1 }
  0x44   : > { %499 = vmatpush3.msra.mxu0 %v267_v1  ;;  %v245_v7 = vmul.f32 %v243_v6, %v243_v6  ;;  %v263_v8 = vld [vmem:[%s883_s28 + $0x58] sm:$0xff]  ;;  %v262_v9 = vld [vmem:[%s883_s28 + $0x50] sm:$0xff]  ;;  %v260_v11 = vld [vmem:[%s883_s28 + $0x40] sm:$0xff] }
  0x45   : > { %500 = vmatprep.subr.mxu0 %v756_v2  ;;  %v259_v12 = vld [vmem:[%s883_s28 + $0x38] sm:$0xff]  ;;  %v258_v13 = vld [vmem:[%s883_s28 + $0x30] sm:$0xff]  ;;  %v257_v14 = vld [vmem:[%s883_s28 + $0x28] sm:$0xff] }
  0x46   : > { %501 = vmatpush3.msra.mxu0 %v266_v3  ;;  %246 = vadd.xlane.f32.xlu0 %v245_v7  ;;  %v256_v15 = vld [vmem:[%s883_s28 + $0x20] sm:$0xff]  ;;  %v255_v16 = vld [vmem:[%s883_s28 + $0x18] sm:$0xff]  ;;  %v254_v17 = vld [vmem:[%s883_s28 + $0x10] sm:$0xff] }
  0x47   : > { %502 = vmatprep.subr.mxu0 %v756_v2  ;;  %v253_v18 = vld [vmem:[%s883_s28 + $0x8] sm:$0xff]  ;;  %v252_v19 = vld [vmem:[%s883_s28] sm:$0xff] }
  0x48   : > { %503 = vmatpush3.msra.mxu0 %v265_v4  ;;  %v244_v20 = vld [vmem:[#allocation3] sm:$0xff]  ;;  %v251_v23 = vld [vmem:[#allocation2] sm:$0xff] }
  0x49   : > { %504 = vmatprep.subr.mxu0 %v756_v2 }
  0x4a   : > { %505 = vmatpush3.msra.mxu0 %v264_v5 }
  0x4b   : > { %506 = vmatprep.subr.mxu0 %v756_v2 }
  0x4c   : > { %507 = vmatpush3.msra.mxu0 %v263_v8 }
  0x4d   : > { %508 = vmatprep.subr.mxu0 %v756_v2 }
  0x4e   : > { %509 = vmatpush3.msra.mxu0 %v262_v9 }
  0x4f   : > { %510 = vmatprep.subr.mxu0 %v756_v2 }
  0x50   : > { %511 = vmatpush3.msra.mxu0 %v261_v10 }
  0x51   : > { %512 = vmatprep.subr.mxu0 %v756_v2 }
  0x52   : > { %513 = vmatpush3.msra.mxu0 %v260_v11 }
  0x53   : > { %514 = vmatprep.subr.mxu0 %v756_v2 }
  0x54   : > { %515 = vmatpush3.msra.mxu0 %v259_v12 }
  0x55   : > { %516 = vmatprep.subr.mxu0 %v756_v2 }
  0x56   : > { %517 = vmatpush3.msra.mxu0 %v258_v13 }
  0x57   : > { %518 = vmatprep.subr.mxu0 %v756_v2 }
  0x58   : > { %519 = vmatpush3.msra.mxu0 %v257_v14 }
  0x59   : > { %520 = vmatprep.subr.mxu0 %v756_v2 }
  0x5a   : > { %521 = vmatpush3.msra.mxu0 %v256_v15 }
  0x5b   : > { %522 = vmatprep.subr.mxu0 %v756_v2 }
  0x5c   : > { %523 = vmatpush3.msra.mxu0 %v255_v16 }
  0x5d   : > { %524 = vmatprep.subr.mxu0 %v756_v2 }
  0x5e   : > { %525 = vmatpush3.msra.mxu0 %v254_v17 }
  0x5f   : > { %526 = vmatprep.subr.mxu0 %v756_v2 }
  0x60   : > { %527 = vmatpush3.msra.mxu0 %v253_v18 }
  0x61   : > { %528 = vmatprep.subr.mxu0 %v756_v2 }
  0x62   : > { %529 = vmatpush3.msra.mxu0 %v252_v19 }
  0x63   : > { %531 = vmatmul.mubr.f32.vlgmr.msra.gmra.mxu0 %v243_v6 }
  0xcf   : > { %v247_v21 = vpop.xlane.xlu0 %246 }
  0xd0   : > { %v248_v22 = vadd.f32 %v247_v21, %v244_v20 }
  0xd2   : > { %250 = vst.msk [vmem:[#allocation3] sm:$0xff] %vm249_vm2, %v248_v22 }
 0x122   : > { %343 = sbr.rel (%p474_p7) target bundleno = 595 (0x253), region = 48 }
 0x123   : > { %v334_v24 = vpop.f32.mrf.mxu0 }
 0x124   : > { %v338_v25 = vadd.f32 %v334_v24, %v251_v23 }
 0x125   : > { %v532_v26 = vpop.f32.mrf.mxu0 }
 0x126   : > { %339 = vst [vmem:[#allocation2] sm:$0xff] %v338_v25 }
 0x127   : > { %v344_v27 = vld [vmem:[#allocation3] sm:$0xff]  ;;  %v758_v28 = vmov 0   ;;  %v475_v31 = vld [vmem:[%s947_s2] ss:$0 sm:$0xff] }
 0x128   : > { %606 = vset.pattern.permute.xlu0 %v758_v28  ;;  %607 = vrsqrt.f32 %v344_v27 }
 0x12d   : > { %v346_v30 = vld [vmem:[#allocation2] sm:$0xff] }
 0x135   : > { %v608_v29 = vpop.eup %607 }
 0x136   : > { %349 = vperm.xlu0 %606, %v608_v29  }
 0x1b1   : > { %v350_v32 = vpop.permute.xlu0 %349 }
 0x1b2   : > { %v352_v33 = vmul.f32 %v350_v32, %v346_v30 }
 0x1b4   : > { %v360_v34 = vadd.f32 %v475_v31, %v352_v33 }
 0x1b6   : > { %v361_v35 = vmul.f32 %v360_v34, %v360_v34 }
 0x1b8   : > { %362 = vadd.xlane.f32.xlu0 %v361_v35 }
 0x241   : > { %v363_v36 = vpop.xlane.xlu0 %362 }
 0x242   : > { %609 = vrsqrt.f32 %v363_v36 }
 0x24f   : > { %v610_v37 = vpop.eup %609 }
 0x250   : > { %v365_v38 = vmul.f32 %v610_v37, %v360_v34 }
 0x252   : > { %366 = vst [vmem:[#allocation9] sm:$0xff] %v365_v38 }
 0x253 PF: > { %p912_p12 = scmp.eq.s32.totalorder %s462_s18, 1  ;;  %s759_s12 = smov [#allocation9]  }
 0x254   : > { %s376_s27 = sshll.u32 %s759_s12, 4  ;;  %s377_s27 = int_to_ptr.vmem [resolvable:$true] %s376_s27 }
 0x255   : > { %s667_s29 = scalar_lea.vmem %s377_s27, 128  ;;  %p674_p6 = scmp.lt.s32.totalorder %s377_s27, %s377_s27 }
 0x256   : > { %p668_p3 = scmp.ne.s32.totalorder %s377_s27, %s667_s29  ;;  %p675_p8 = scmp.lt.s32.totalorder %s667_s29, %s667_s29 }
 0x258   : > { %p669_p4 = pnand %p668_p3, %p912_p12  ;;  %p676_p13 = por %p675_p8, %p674_p6 }
 0x25a   : > { %p670_p5 = pneg %p669_p4 }
 0x25c   : > { %p677_p0 = pnand %p676_p13, %p670_p5 }
 0x25e   : > { %680 = shalt.err (!%p677_p0)
}
 0x25f   : > { %538 = dma.vmem_to_hbm [thread:$0]  (%p912_p12), %s377_s27, 128, %s948_s3, [#allocation6]  }
 0x260   : > { %724 = dma.done.wait (%p912_p12), [#allocation6], 128  }
 0x261   : > { %726 = vsyncadd (%p912_p12), [#allocation6], 4294967168 }
 0x262 PF: > { %s20_s17 = sadd.s32 1, %s749_s17   ;;  %s954_s12 = smov %s733_s13 }
 0x263   : > { %p17_p10 = scmp.ge.s32.totalorder %s20_s17, 4   ;;  %s955_s13 = smov %s737_s14 }
 0x264   : > { %s956_s14 = smov %s831_s24  ;;  %s957_s15 = smov %s745_s16 }
 0x265   : > { %s958_s16 = smov %s960_s19  ;;  %19 = sbr.rel (!%p17_p10) target bundleno = 7 (0x7), region = 91 }
 0x26a   :  { %389 = vsyncpa [#allocation5], 1 }
 0x26b   :  { %391 = vsyncpa [#allocation5 + $0x1], 1 }
 0x26c   :  { %392 = vsyncpa [#allocation8], 1 }
 0x26d   :  { %394 = vsyncpa [#allocation8 + $0x1], 1 }
 0x26e   :  { %395 = vsyncpa [#allocation6], 1 }
 0x26f   :  { %397 = vsyncpa [#allocation6 + $0x1], 1 }

</bundles_post_ra>
